<compile_context>
chip_gen: v7x
topology: tpu7x:2x2x1
jax: 0.10.0
libtpu: 0.0.40
codegen_flags: <defaults>
</compile_context>

<pallas_src>
import math

import jax
import jax.numpy as jnp
from jax import lax
from jax.experimental import pallas as pl
from jax.experimental.pallas import tpu as pltpu


def _round_up(n, m):
    return ((n + m - 1) // m) * m


# dot_general dimension numbers for A @ B^T (contract over the LAST dim of both
# operands) — the same trans-B pattern the Pallas flash-attention kernel uses.
_TRANS_B_DIMS = (((1,), (1,)), ((), ()))


def _mlp_kernel(x_ref, w1_ref, b1_ref, w2_ref, b2_ref, w3_ref, b3_ref, o_ref):
    """One batch tile of the fused 3-layer MLP.

    x_ref is (tb, i_size) exactly as x sits in HBM (no wrapper transpose).  The first
    matmul contracts over i_size on both operands (W1 @ x^T), so all intermediates and
    the output are (features, batch) with batch on the lane dimension (lane-dense).
    """
    x = x_ref[...]                                                    # (tb, i_size)
    h1 = lax.dot_general(w1_ref[...], x, _TRANS_B_DIMS,
                         preferred_element_type=jnp.float32)          # (d1, tb)
    h1 = jnp.maximum(h1 + b1_ref[...], 0.0)                           # relu(linear_1(dropout(x)))
    h2 = jnp.dot(w2_ref[...], h1.astype(w2_ref.dtype),
                 preferred_element_type=jnp.float32)                  # (d2, tb)
    h2 = jnp.maximum(h2 + b2_ref[...], 0.0)                           # relu(linear_2(dropout(h1)))
    o = jnp.dot(w3_ref[...], h2.astype(w3_ref.dtype),
                preferred_element_type=jnp.float32)                   # (1, tb)
    o_ref[...] = (o + b3_ref[...]).astype(o_ref.dtype)                # last_linear, lane-dense store


def _choose_batch_tile(B, i_size, itemsize, block_b):
    """Pick the batch (lane) tile.

    Goals: as large as possible (amortize ~0.35us per-grid-step overhead), keep the
    double-buffered x tile comfortably under the 16 MiB v5e scoped-VMEM default,
    multiple of 128 lanes whenever the grid has >1 step, and >=2 grid steps for larger
    batches so both TensorCores get work on megacore parts (v7x).
    """
    b8 = _round_up(max(int(B), 1), 8)
    budget = 12 * 1024 * 1024                       # x double-buffer budget (v5e-safe)
    vmem_cap = max(128, ((budget // (2 * max(int(i_size), 1) * itemsize)) // 128) * 128)
    tb = max(128, _round_up(min(int(block_b), vmem_cap), 128))
    if b8 > 256:                                    # enough batch to split across 2 TCs
        tb = min(tb, max(128, _round_up(pl.cdiv(b8, 2), 128)))
    if tb >= b8:
        tb = b8                                     # single grid step: block == whole batch
    return tb


def dense_model1_forward(x, params, *, block_b=32768, compute_dtype=None):
    """x: (B, i_size).  params: PyTorch-layout weights (out,in) / biases (out,1).

    Returns (B, 1) float32, matching dense_model1.forward in eval mode.  For best HBM
    efficiency on v6e/v7x, pass x already in bfloat16 (compute dtype follows x.dtype).
    """
    w1, b1 = params["w1"], params["b1"]
    w2, b2 = params["w2"], params["b2"]
    w3, b3 = params["w3"], params["b3"]
    B, i_size = x.shape
    assert w1.shape[1] == i_size

    cdt = x.dtype if compute_dtype is None else jnp.dtype(compute_dtype)
    if x.dtype != cdt:
        # NOTE: this is a full extra HBM pass over x; prefer producing x in `cdt` upstream.
        x = x.astype(cdt)
    w1c, w2c, w3c = (w.astype(cdt) for w in (w1, w2, w3))
    b1c, b2c, b3c = (b.astype(jnp.float32) for b in (b1, b2, b3))

    itemsize = jnp.dtype(cdt).itemsize
    tb = _choose_batch_tile(B, i_size, itemsize, block_b)
    n_steps = pl.cdiv(B, tb)
    out_lanes = n_steps * tb            # output writes always in-bounds; sliced to B below

    def resident(arr):
        # Whole small array as one block with a constant index_map: stays VMEM-resident,
        # no per-step DMA re-issue (weights/biases are tiny).
        return pl.BlockSpec(arr.shape, lambda i: (0, 0))

    d1, d2 = int(w1.shape[0]), int(w2.shape[0])
    cost = pl.CostEstimate(
        flops=int(2 * B * (i_size * d1 + d1 * d2 + d2 * 1)),
        transcendentals=0,
        bytes_accessed=int(B * i_size * itemsize + B * 4
                           + sum(int(a.size) * itemsize for a in (w1c, w2c, w3c))),
    )

    out = pl.pallas_call(
        _mlp_kernel,
        grid=(n_steps,),
        in_specs=[
            pl.BlockSpec((tb, i_size), lambda i: (i, 0)),   # x tile, native (B, i_size) layout
            resident(w1c), resident(b1c),
            resident(w2c), resident(b2c),
            resident(w3c), resident(b3c),
        ],
        out_specs=pl.BlockSpec((1, tb), lambda i: (0, i)),  # lane-dense (1, tb) output
        out_shape=jax.ShapeDtypeStruct((1, out_lanes), jnp.float32),
        compiler_params=pltpu.CompilerParams(
            dimension_semantics=("parallel",),              # batch axis shards across TCs
        ),
        cost_estimate=cost,
    )(x, w1c, b1c, w2c, b2c, w3c, b3c)

    return out[:, :B].T                                     # (B, 1)


def init_params(key, i_size, deep_layers=None):
    """PyTorch nn.Linear default init: U(-1/sqrt(fan_in), 1/sqrt(fan_in)).

    Weights stored PyTorch-style (out_features, in_features); biases (out_features, 1).
    """
    if deep_layers is None:
        deep_layers = [i_size, 8, 2]
    assert deep_layers[0] == i_size and len(deep_layers) == 3
    layers = list(deep_layers) + [1]                        # linear_1, linear_2, last_linear
    params = {}
    for n, (fan_in, fan_out) in enumerate(zip(layers[:-1], layers[1:]), start=1):
        key, kw, kb = jax.random.split(key, 3)
        bound = 1.0 / math.sqrt(fan_in)
        params[f"w{n}"] = jax.random.uniform(
            kw, (fan_out, fan_in), jnp.float32, minval=-bound, maxval=bound)
        params[f"b{n}"] = jax.random.uniform(
            kb, (fan_out, 1), jnp.float32, minval=-bound, maxval=bound)
    return params


def reference_forward(x, params):
    h = jnp.maximum(x @ params["w1"].T + params["b1"].T, 0.0)
    h = jnp.maximum(h @ params["w2"].T + params["b2"].T, 0.0)
    return h @ params["w3"].T + params["b3"].T


if __name__ == "__main__":
    key = jax.random.PRNGKey(0)
    k_x, k_p = jax.random.split(key)

    batch, i_size = 8, 32
    x = jax.random.normal(k_x, (batch, i_size), jnp.float32)
    params = init_params(k_p, i_size)

    out = dense_model1_forward(x, params)
    out = jax.block_until_ready(out)

    ref = reference_forward(x, params)
    assert out.shape == (batch, 1), out.shape
    assert jnp.allclose(out, ref, atol=1e-5, rtol=1e-5), (out, ref)

    print("KERNEL_OK")
</pallas_src>

<mosaic_0001>
module attributes {stable_mosaic.version = 11 : i64} {
  func.func @_mlp_kernel(%arg0: i32, %arg1: memref<8x32xf32, #tpu.memory_space<vmem>>, %arg2: memref<8x32xf32, #tpu.memory_space<vmem>>, %arg3: memref<8x1xf32, #tpu.memory_space<vmem>>, %arg4: memref<2x8xf32, #tpu.memory_space<vmem>>, %arg5: memref<2x1xf32, #tpu.memory_space<vmem>>, %arg6: memref<1x2xf32, #tpu.memory_space<vmem>>, %arg7: memref<1x1xf32, #tpu.memory_space<vmem>>, %arg8: memref<1x8xf32, #tpu.memory_space<vmem>>) attributes {dimension_semantics = [#tpu.dimension_semantics<parallel>], iteration_bounds = array<i64: 1>, scalar_prefetch = 0 : i64, scratch_operands = 0 : i64, tpu.core_type = #tpu.core_type<tc>, window_params = [{transform_indices = @transform_0, window_bounds = array<i64: 8, 32>}, {pipeline_mode = #tpu.pipeline_mode<synchronous>, transform_indices = @transform_1, window_bounds = array<i64: 8, 32>}, {pipeline_mode = #tpu.pipeline_mode<synchronous>, transform_indices = @transform_2, window_bounds = array<i64: 8, 1>}, {pipeline_mode = #tpu.pipeline_mode<synchronous>, transform_indices = @transform_3, window_bounds = array<i64: 2, 8>}, {pipeline_mode = #tpu.pipeline_mode<synchronous>, transform_indices = @transform_4, window_bounds = array<i64: 2, 1>}, {pipeline_mode = #tpu.pipeline_mode<synchronous>, transform_indices = @transform_5, window_bounds = array<i64: 1, 2>}, {pipeline_mode = #tpu.pipeline_mode<synchronous>, transform_indices = @transform_6, window_bounds = array<i64: 1, 1>}, {transform_indices = @transform_7, window_bounds = array<i64: 1, 8>}]} {
    %c0 = arith.constant 0 : index
    %c0_0 = arith.constant 0 : index
    %0 = vector.load %arg1[%c0, %c0_0] : memref<8x32xf32, #tpu.memory_space<vmem>>, vector<8x32xf32>
    %c0_1 = arith.constant 0 : index
    %c0_2 = arith.constant 0 : index
    %1 = vector.load %arg2[%c0_1, %c0_2] : memref<8x32xf32, #tpu.memory_space<vmem>>, vector<8x32xf32>
    %cst = arith.constant dense<0.000000e+00> : vector<8x8xf32>
    %2 = tpu.matmul %1, %0, %cst {dimension_numbers = #tpu.dot_dimension_numbers<[1], [1], [0], [0], [0, 0, 1, 0], [], []>} : vector<8x32xf32>, vector<8x32xf32>, vector<8x8xf32> -> vector<8x8xf32>
    %c0_3 = arith.constant 0 : index
    %c0_4 = arith.constant 0 : index
    %3 = vector.load %arg3[%c0_3, %c0_4] : memref<8x1xf32, #tpu.memory_space<vmem>>, vector<8x1xf32>
    %4 = vector.broadcast %3 : vector<8x1xf32> to vector<8x8xf32>
    %5 = arith.addf %2, %4 : vector<8x8xf32>
    %cst_5 = arith.constant 0.000000e+00 : f32
    %6 = vector.broadcast %cst_5 : f32 to vector<8x8xf32>
    %7 = arith.maximumf %5, %6 : vector<8x8xf32>
    %c0_6 = arith.constant 0 : index
    %c0_7 = arith.constant 0 : index
    %8 = vector.load %arg4[%c0_6, %c0_7] : memref<2x8xf32, #tpu.memory_space<vmem>>, vector<2x8xf32>
    %cst_8 = arith.constant dense<0.000000e+00> : vector<2x8xf32>
    %9 = tpu.matmul %8, %7, %cst_8 {dimension_numbers = #tpu.dot_dimension_numbers<[1], [0], [0], [1], [0, 0, 1, 1], [], []>} : vector<2x8xf32>, vector<8x8xf32>, vector<2x8xf32> -> vector<2x8xf32>
    %c0_9 = arith.constant 0 : index
    %c0_10 = arith.constant 0 : index
    %10 = vector.load %arg5[%c0_9, %c0_10] : memref<2x1xf32, #tpu.memory_space<vmem>>, vector<2x1xf32>
    %11 = vector.broadcast %10 : vector<2x1xf32> to vector<2x8xf32>
    %12 = arith.addf %9, %11 : vector<2x8xf32>
    %cst_11 = arith.constant 0.000000e+00 : f32
    %13 = vector.broadcast %cst_11 : f32 to vector<2x8xf32>
    %14 = arith.maximumf %12, %13 : vector<2x8xf32>
    %c0_12 = arith.constant 0 : index
    %c0_13 = arith.constant 0 : index
    %15 = vector.load %arg6[%c0_12, %c0_13] : memref<1x2xf32, #tpu.memory_space<vmem>>, vector<1x2xf32>
    %cst_14 = arith.constant dense<0.000000e+00> : vector<1x8xf32>
    %16 = tpu.matmul %15, %14, %cst_14 {dimension_numbers = #tpu.dot_dimension_numbers<[1], [0], [0], [1], [0, 0, 1, 1], [], []>} : vector<1x2xf32>, vector<2x8xf32>, vector<1x8xf32> -> vector<1x8xf32>
    %c0_15 = arith.constant 0 : index
    %c0_16 = arith.constant 0 : index
    %17 = vector.load %arg7[%c0_15, %c0_16] : memref<1x1xf32, #tpu.memory_space<vmem>>, vector<1x1xf32>
    %18 = vector.broadcast %17 : vector<1x1xf32> to vector<1x8xf32>
    %19 = arith.addf %16, %18 : vector<1x8xf32>
    %c0_17 = arith.constant 0 : index
    %c0_18 = arith.constant 0 : index
    %20 = vector.load %arg8[%c0_17, %c0_18] : memref<1x8xf32, #tpu.memory_space<vmem>>, vector<1x8xf32>
    tpu.vector_store %arg8[%c0_17, %c0_18], %19 {strides = array<i32>} : memref<1x8xf32, #tpu.memory_space<vmem>>, vector<1x8xf32>,
    return
  }
  func.func @transform_0(%arg0: i32) -> (i32, i32) {
    %c0_i32 = arith.constant 0 : i32
    %c0_i32_0 = arith.constant 0 : i32
    return %arg0, %c0_i32 : i32, i32
  }
  func.func @transform_1(%arg0: i32) -> (i32, i32) {
    %c0_i32 = arith.constant 0 : i32
    %c0_i32_0 = arith.constant 0 : i32
    %c0_i32_1 = arith.constant 0 : i32
    return %c0_i32, %c0_i32_0 : i32, i32
  }
  func.func @transform_2(%arg0: i32) -> (i32, i32) {
    %c0_i32 = arith.constant 0 : i32
    %c0_i32_0 = arith.constant 0 : i32
    %c0_i32_1 = arith.constant 0 : i32
    return %c0_i32, %c0_i32_0 : i32, i32
  }
  func.func @transform_3(%arg0: i32) -> (i32, i32) {
    %c0_i32 = arith.constant 0 : i32
    %c0_i32_0 = arith.constant 0 : i32
    %c0_i32_1 = arith.constant 0 : i32
    return %c0_i32, %c0_i32_0 : i32, i32
  }
  func.func @transform_4(%arg0: i32) -> (i32, i32) {
    %c0_i32 = arith.constant 0 : i32
    %c0_i32_0 = arith.constant 0 : i32
    %c0_i32_1 = arith.constant 0 : i32
    return %c0_i32, %c0_i32_0 : i32, i32
  }
  func.func @transform_5(%arg0: i32) -> (i32, i32) {
    %c0_i32 = arith.constant 0 : i32
    %c0_i32_0 = arith.constant 0 : i32
    %c0_i32_1 = arith.constant 0 : i32
    return %c0_i32, %c0_i32_0 : i32, i32
  }
  func.func @transform_6(%arg0: i32) -> (i32, i32) {
    %c0_i32 = arith.constant 0 : i32
    %c0_i32_0 = arith.constant 0 : i32
    %c0_i32_1 = arith.constant 0 : i32
    return %c0_i32, %c0_i32_0 : i32, i32
  }
  func.func @transform_7(%arg0: i32) -> (i32, i32) {
    %c0_i32 = arith.constant 0 : i32
    %c0_i32_0 = arith.constant 0 : i32
    return %c0_i32, %arg0 : i32, i32
  }
}

</mosaic_0001>

<bundles_post_ra>
// kernel: tpu_custom_call.1
= control target key start
LH: loop header
LB: loop body
LE: loop exit
PB: predicated region body
PF: predicated region fallthrough
CT: control target
= control target key end

     0   :  { %s440_s0 = inlined_call_operand.vmem [shape: f32[8,32], index: 0, kind: input, shape index: {}]   ;;  %s441_s1 = inlined_call_operand.vmem [shape: f32[8,32], index: 1, kind: input, shape index: {}]   ;;  %s442_s2 = inlined_call_operand.vmem [shape: f32[8,1], index: 2, kind: input, shape index: {}]   ;;  %s443_s3 = inlined_call_operand.vmem [shape: f32[2,8], index: 3, kind: input, shape index: {}]   ;;  %s444_s4 = inlined_call_operand.vmem [shape: f32[2,1], index: 4, kind: input, shape index: {}]   ;;  %s445_s5 = inlined_call_operand.vmem [shape: f32[1,2], index: 5, kind: input, shape index: {}]   ;;  %s446_s6 = inlined_call_operand.<no memory space> [shape: f32[1,1], index: 6, kind: input, shape index: {}]   ;;  %s447_s7 = inlined_call_operand.hbm [shape: f32[1,8], index: 7, kind: output, shape index: {}]  }
   0x1   :  { %v12_v0 = vstv %s446_s6 }
   0x2   :  { %13 = vst [vmem:[#allocation2] sm:$0x1] %v12_v0 }
   0x3   :  { %v29_v1 = vld [vmem:[%s440_s0] sm:$0xff]  ;;  %vm37_vm0 = vcmask 261120   ;;  %v358_v2 = vmov 0.0   ;;  %vm359_vm1 = vmmov 0  }
   0x4   :  { %313 = vmatprep.subr.mxu0 %v358_v2  ;;  %315 = vmatprep.mubr.msk.f32.mxu0 %vm359_vm1, %v358_v2  ;;  %v31_v3 = vld [vmem:[%s442_s2] sm:$0xff] }
   0x5   :  { %14 = vsyncpa [#allocation4], 0  ;;  %314 = vmatpush3.xpose.msk.msra.mxu0 %vm37_vm0, %v29_v1  ;;  %v30_v4 = vld [vmem:[%s441_s1] sm:$0xff]  ;;  %v360_v5 = vmov 0   ;;  %318 = vmatprep.subr.mxu1 %v358_v2  ;;  %vm122_vm2 = vcmask 64512   ;;  %vm212_vm3 = vcmask 1041408   ;;  %v204_v20 = vlaneseq }
   0x6   :  { %332 = vset.pattern.permute.xlu0 %v360_v5  ;;  %v116_v6 = vld [vmem:[%s444_s4] sm:$0x3]  ;;  %320 = vmatprep.mubr.msk.f32.mxu1 %vm359_vm1, %v358_v2  ;;  %vm208_vm4 = vcmask 15360   ;;  %vm286_vm5 = vcmask 57344  }
   0x7   :  { %34 = vperm.xlu0 %332, %v31_v3   ;;  %333 = vset.pattern.permute.xlu1 %v360_v5  ;;  %v115_v12 = vld [vmem:[%s443_s3] sm:$0x3]  ;;  %v205_v21 = vshrl.u32 %v204_v20, 7  ;;  %s361_s3 = smov [#allocation3]  }
   0x8   :  { %316 = vmatmul.mubr.msk.f32.vlgmr.msra.gmra.mrb[0].mxu0 %vm37_vm0, %v30_v4  ;;  %v197_v19 = vld [vmem:[%s445_s5] sm:$0x1]  ;;  %s294_s10 = sshll.u32 %s361_s3, 4  ;;  %s295_s10 = int_to_ptr.vmem [resolvable:$true] %s294_s10 }
   0x9   :  { %v198_v13 = vld [vmem:[#allocation2] sm:$0x1]  ;;  %v206_v22 = vsub.s32 0, %v205_v21  ;;  %s334_s11 = scalar_lea.vmem %s295_s10, 16  ;;  %s338_s12 = scalar_lea.vmem %s295_s10, 32 }
   0xa   :  { %201 = vperm.xlu1 %333, %v198_v13   ;;  %p335_p0 = scmp.ne.s32.totalorder %s295_s10, %s334_s11  ;;  %p339_p1 = scmp.lt.s32.totalorder %s295_s10, %s295_s10 }
   0xb   :  { %119 = vperm.xlu0 %332, %v116_v6   ;;  %p340_p2 = scmp.lt.s32.totalorder %s338_s12, %s334_s11 }
   0xd   :  { %p341_p3 = por %p340_p2, %p339_p1 }
   0xf   :  { %p342_p4 = pnand %p341_p3, %p335_p0 }
  0x86   :  { %v35_v7 = vpop.permute.xlu0 %34 }
  0x89   :  { %v202_v23 = vpop.permute.xlu1 %201 }
  0x8a   :  { %v120_v14 = vpop.permute.xlu0 %119  ;;  %v207_v24 = vrot.slane %v202_v23, %v206_v22 }
  0xdb   :  { %v110_v8 = vpop.f32.mrb[0].mxu0 }
  0xdc   :  { %v111_v9 = vadd.f32 %v110_v8, %v35_v7  ;;  %v317_v10 = vpop.f32.mrb[1].mxu0 }
  0xde   :  { %v114_v11 = vmax.f32 %v111_v9, 0.0 }
  0xe0   :  { %319 = vmatpush3.msra.mxu1 %v114_v11 }
  0xe1   :  { %321 = vmatmul.mubr.msk.f32.vlgmr.msra.gmra.mrb[0].mxu1 %vm122_vm2, %v115_v12  ;;  %323 = vmatprep.subr.mxu1 %v358_v2 }
  0xe2   :  { %325 = vmatprep.mubr.msk.f32.mxu1 %vm359_vm1, %v358_v2 }
 0x1b4   :  { %v192_v15 = vpop.f32.mrb[0].mxu1 }
 0x1b5   :  { %v193_v16 = vadd.f32 %v192_v15, %v120_v14  ;;  %v322_v17 = vpop.f32.mrb[1].mxu1 }
 0x1b7   :  { %v196_v18 = vmax.f32 %v193_v16, 0.0 }
 0x1b9   :  { %324 = vmatpush3.msk.msra.mxu1 %vm212_vm3, %v196_v18 }
 0x1ba   :  { %326 = vmatmul.mubr.msk.f32.vlgmr.msra.gmra.mrb[2].mxu1 %vm208_vm4, %v197_v19 }
 0x28d   :  { %v282_v25 = vpop.f32.mrb[2].mxu1 }
 0x28e   :  { %v283_v26 = vadd.f32 %v282_v25, %v207_v24  ;;  %v327_v27 = vpop.f32.mrb[3].mxu1 }
 0x290   :  { %287 = vst.msk [vmem:[#allocation3] sm:$0x1] %vm286_vm5, %v283_v26 }
 0x291   :  { %345 = shalt.err (!%p342_p4)
}
 0x292   :  { %s346_s14 = scalar_lea.hbm %s447_s7, 16 }
 0x293   :  { %p347_p5 = scmp.ne.s32.totalorder %s447_s7, %s346_s14  ;;  %p350_p6 = scmp.lt.u32.totalorder %s346_s14, %s447_s7 }
 0x295   :  { %p352_p7 = pnand %p350_p6, %p347_p5 }
 0x297   :  { %355 = shalt.err (!%p352_p7)
}
 0x298   :  { %297 = dma.vmem_to_hbm [thread:$0]  %s295_s10, 16, %s447_s7, [#allocation4]  }
 0x299   :  { %356 = dma.done.wait [#allocation4], 16  }
 0x29a   :  { %357 = vsyncadd [#allocation4], 4294967280 }
 0x29b   :  { %301 = vsyncpa [#allocation4], 1 }

</bundles_post_ra>
